<compile_context>
chip_gen: v7x
topology: tpu7x:2x2x1
jax: 0.10.0
libtpu: 0.0.40
codegen_flags: <defaults>
</compile_context>

<pallas_src>
import functools

import jax
import jax.numpy as jnp
from jax import lax
from jax.experimental import pallas as pl
from jax.experimental.pallas import tpu as pltpu


def _sep_conv1d_kernel(x_ref, halo_ref, mask_ref, dw_ref, pw_ref, side_ref,
                       out_ref, *, seq_len, apply_act):
    """One (batch, time-tile) step: depthwise(k=3) -> pointwise(1x1, BN folded)."""
    TT = x_ref.shape[2]

    # Elementwise / depthwise math in f32 (v5e has no bf16 VPU); MXU feed may be bf16.
    x = x_ref[0].astype(jnp.float32)            # (Cin, TT)
    halo = halo_ref[0, 0].astype(jnp.float32)   # (Cin, 2): [:,0]=x[:,t0-1], [:,1]=x[:,t0+TT]
    col = lax.broadcasted_iota(jnp.int32, (1, TT), 1)

    # Ragged last tile: columns >= seq_len hold unspecified values (no host-side pad),
    # zero them so the k=3 stencil of the last valid column is correct.  Emitted only
    # when T is not tile-aligned.
    if seq_len % TT:
        gcol = col + pl.program_id(1) * TT
        x = jnp.where(gcol < seq_len, x, 0.0)

    # ---- depthwise conv: kernel_size=3, padding=1, groups=C, bias=False ----
    w0 = dw_ref[:, 0:1]        # (Cin, 1) per-channel taps (f32)
    w1 = dw_ref[:, 1:2]
    w2 = dw_ref[:, 2:3]
    y = w1 * x
    # left neighbour: roll right by 1; patch the wrapped col 0 with the halo column.
    y = y + w0 * jnp.where(col == 0, halo[:, 0:1], pltpu.roll(x, shift=1, axis=1))
    # right neighbour: roll left by 1 (== non-negative shift TT-1); patch col TT-1.
    y = y + w2 * jnp.where(col == TT - 1, halo[:, 1:2],
                           pltpu.roll(x, shift=TT - 1, axis=1))
    # NOTE: no pre-matmul masking; the mask is per-time-column so
    #       W @ (y * m) == (W @ y) * m and the epilogue select applies it.

    # ---- pointwise 1x1 conv == channel matmul on the MXU (BN scale pre-folded) ----
    z = jnp.dot(pw_ref[...], y.astype(pw_ref.dtype),
                preferred_element_type=jnp.float32)          # (Cout, TT) f32

    # ---- epilogue: masked bias + BN shift in one select ----
    # side[:,0] = bn_scale*pw_bias + bn_shift (valid frames), side[:,1] = bn_shift (padded).
    mb = mask_ref[0] > 0.0                                    # (1, TT)
    out = jnp.where(mb, z + side_ref[:, 0:1], side_ref[:, 1:2])
    if apply_act:                                             # Swish / SiLU (default False)
        out = out * jax.nn.sigmoid(out)
    out_ref[0] = out.astype(out_ref.dtype)


def separable_conv1d_block(x, mask, params, activation=False, norm=True,
                           t_tile=None, mxu_dtype=jnp.bfloat16):
    """Forward pass of SeparableConv1DBlock (inference-mode BatchNorm).

    x:    (B, Cin, T), any float dtype (bf16 recommended; kernel is HBM-bound).
    mask: (B, 1, T) bool, True = valid frame.
    Returns (out, mask); out is (B, Cout, T) in x.dtype.
    """
    B, Cin, T = x.shape
    Cout = params["pw_w"].shape[0]
    mxu_dtype = mxu_dtype or jnp.float32

    # ---- fold BatchNorm (inference, running stats; module eps=0.001) into the 1x1 conv ----
    # TODO(synk): training-mode BatchNorm1d (batch statistics) would need a
    # cross-batch/cross-tile reduction; inference-mode running stats are folded here.
    if norm:
        eps = 1e-3
        bn_scale = params["bn_gamma"] / jnp.sqrt(params["bn_var"] + eps)
        bn_shift = params["bn_beta"] - params["bn_mean"] * bn_scale
    else:
        bn_scale = jnp.ones((Cout,), jnp.float32)
        bn_shift = jnp.zeros((Cout,), jnp.float32)
    pw_folded = (bn_scale[:, None] * params["pw_w"]).astype(mxu_dtype)
    side = jnp.stack([bn_scale * params["pw_b"] + bn_shift, bn_shift],
                     axis=1).astype(jnp.float32)                      # (Cout, 2)

    # ---- per-generation tile / VMEM budget (no host pad, ragged tail handled in-kernel) ----
    io_bytes = jnp.dtype(x.dtype).itemsize
    mxu_bytes = jnp.dtype(mxu_dtype).itemsize
    try:
        vmem_cap = pltpu.get_tpu_info().vmem_capacity_bytes
    except Exception:
        vmem_cap = 64 << 20                     # conservative (v7x-class) fallback
    if t_tile is None:
        t_tile = 1024 if vmem_cap <= (64 << 20) else 2048   # v7x vs v5e/v6e
        if io_bytes >= 4:                                   # f32 I/O -> halve the lane tile
            t_tile //= 2
    tt = max(128, min(t_tile, pl.cdiv(T, 128) * 128))       # lane-dense (multiple of 128)
    nT = pl.cdiv(T, tt)

    est = (2 * tt * (Cin + Cout) * io_bytes + 2 * tt * 4 + 2 * Cin * 2 * io_bytes  # pipelined blocks
           + 4 * Cin * tt * 4 + 2 * Cout * tt * 4 + Cin * tt * mxu_bytes           # live f32/bf16 temps
           + 2 * (Cout * Cin * mxu_bytes + Cin * 3 * 4 + Cout * 2 * 4))            # weights
    vmem_limit = int(min(3 * vmem_cap // 4, max(32 << 20, 2 * est)))

    mp = mask.astype(jnp.float32)               # tiny (B,1,T) side input

    # ---- per-tile halo columns for the k=3 stencil (zeros at the sequence edges) ----
    zcol = jnp.zeros((B, Cin, 1), x.dtype)
    if nT > 1:
        left = jnp.concatenate([zcol, x[:, :, tt - 1::tt][:, :, :nT - 1]], axis=2)
        right = jnp.concatenate([x[:, :, tt::tt][:, :, :nT - 1], zcol], axis=2)
    else:
        left, right = zcol, zcol
    halo = jnp.stack([left, right], axis=-1).transpose(0, 2, 1, 3)     # (B, nT, Cin, 2)

    kernel = functools.partial(_sep_conv1d_kernel, seq_len=T, apply_act=activation)

    out = pl.pallas_call(
        kernel,
        out_shape=jax.ShapeDtypeStruct((B, Cout, T), x.dtype),
        grid=(B, nT),
        in_specs=[
            pl.BlockSpec((1, Cin, tt), lambda b, t: (b, 0, t)),        # x tile
            pl.BlockSpec((1, 1, Cin, 2), lambda b, t: (b, t, 0, 0)),   # halo columns
            pl.BlockSpec((1, 1, tt), lambda b, t: (b, 0, t)),          # mask tile
            pl.BlockSpec((Cin, 3), lambda b, t: (0, 0)),               # depthwise taps (f32)
            pl.BlockSpec((Cout, Cin), lambda b, t: (0, 0)),            # folded pointwise W
            pl.BlockSpec((Cout, 2), lambda b, t: (0, 0)),              # [scale*b + shift, shift]
        ],
        out_specs=pl.BlockSpec((1, Cout, tt), lambda b, t: (b, 0, t)),
        compiler_params=pltpu.CompilerParams(
            dimension_semantics=("parallel", "parallel"),
            vmem_limit_bytes=vmem_limit,
        ),
    )(x, halo, mp, params["dw_w"].astype(jnp.float32), pw_folded, side)
    return out, mask


def _reference(x, mask, params, activation=False):
    """Pure-JAX reference mirroring the PyTorch forward (inference-mode BN, eps=1e-3)."""
    m = mask.astype(x.dtype)
    dw = params["dw_w"][:, None, :]                       # (C, 1, 3) like torch (C,1,K)
    y = lax.conv_general_dilated(
        x, dw, window_strides=(1,), padding=((1, 1),),
        dimension_numbers=("NCH", "OIH", "NCH"),
        feature_group_count=x.shape[1])
    y = y * m
    pw = params["pw_w"][:, :, None]                       # (Cout, Cin, 1)
    z = lax.conv_general_dilated(
        y, pw, window_strides=(1,), padding=((0, 0),),
        dimension_numbers=("NCH", "OIH", "NCH"))
    z = z + params["pw_b"][None, :, None]
    z = z * m
    eps = 1e-3
    scale = params["bn_gamma"] / jnp.sqrt(params["bn_var"] + eps)
    shift = params["bn_beta"] - params["bn_mean"] * scale
    z = z * scale[None, :, None] + shift[None, :, None]
    if activation:
        z = z * jax.nn.sigmoid(z)
    return z, mask


def _make_params(key, cin, cout):
    k_dw, k_pw, k_pb, k_g, k_b, k_m, k_v = jax.random.split(key, 7)
    return dict(
        dw_w=0.1 * jax.random.normal(k_dw, (cin, 3), jnp.float32),      # depthwise (C,1,3) squeezed
        pw_w=0.1 * jax.random.normal(k_pw, (cout, cin), jnp.float32),   # pointwise (Cout,Cin,1) squeezed
        pw_b=0.1 * jax.random.normal(k_pb, (cout,), jnp.float32),
        bn_gamma=1.0 + 0.1 * jax.random.normal(k_g, (cout,), jnp.float32),
        bn_beta=0.1 * jax.random.normal(k_b, (cout,), jnp.float32),
        bn_mean=0.1 * jax.random.normal(k_m, (cout,), jnp.float32),
        bn_var=jnp.abs(jax.random.normal(k_v, (cout,), jnp.float32)) + 0.5,
    )


if __name__ == "__main__":
    key = jax.random.PRNGKey(0)
    k1, k2, k3, k4, k5, k6 = jax.random.split(key, 6)

    # ---- test 1: module defaults (out_channels=None, activation=False); f32 MXU, exact check ----
    B, C, T = 2, 4, 16
    x = jax.random.normal(k1, (B, C, T), jnp.float32)
    mask = jnp.arange(T)[None, None, :] < jnp.array([T, T - 4])[:, None, None]   # (B,1,T) bool
    params = _make_params(k2, C, C)

    out, out_mask = separable_conv1d_block(x, mask, params, activation=False,
                                           mxu_dtype=jnp.float32)
    out = jax.block_until_ready(out)
    ref, _ = _reference(x, mask, params, activation=False)
    assert out.shape == (B, C, T)
    assert jnp.allclose(out, ref, atol=1e-4, rtol=1e-4), float(jnp.max(jnp.abs(out - ref)))
    assert bool(jnp.all(out_mask == mask))

    # ---- test 2: ragged multi-tile time axis (halo + in-kernel tail-zero), Cout != Cin, swish,
    #              default bf16 MXU feed (relaxed tolerance) ----
    B2, C2, Cout2, T2 = 2, 8, 6, 200
    x2 = jax.random.normal(k3, (B2, C2, T2), jnp.float32)
    mask2 = jnp.arange(T2)[None, None, :] < jnp.array([T2, 150])[:, None, None]
    params2 = _make_params(k4, C2, Cout2)

    out2, _ = separable_conv1d_block(x2, mask2, params2, activation=True, t_tile=128)
    out2 = jax.block_until_ready(out2)
    ref2, _ = _reference(x2, mask2, params2, activation=True)
    assert out2.shape == (B2, Cout2, T2)
    assert jnp.allclose(out2, ref2, atol=2e-2, rtol=2e-2), float(jnp.max(jnp.abs(out2 - ref2)))

    # ---- test 3: bf16 I/O end-to-end (recommended production path), tile-aligned T ----
    B3, C3, T3 = 2, 8, 256
    x3 = jax.random.normal(k5, (B3, C3, T3), jnp.float32).astype(jnp.bfloat16)
    mask3 = jnp.arange(T3)[None, None, :] < jnp.array([T3, 180])[:, None, None]
    params3 = _make_params(k6, C3, C3)

    out3, _ = separable_conv1d_block(x3, mask3, params3, activation=False, t_tile=128)
    out3 = jax.block_until_ready(out3)
    ref3, _ = _reference(x3.astype(jnp.float32), mask3, params3, activation=False)
    assert out3.shape == (B3, C3, T3) and out3.dtype == jnp.bfloat16
    assert jnp.allclose(out3.astype(jnp.float32), ref3, atol=5e-2, rtol=5e-2), \
        float(jnp.max(jnp.abs(out3.astype(jnp.float32) - ref3)))

    print("KERNEL_OK")
</pallas_src>

<mosaic_0001>
module attributes {stable_mosaic.version = 11 : i64} {
  func.func @_sep_conv1d_kernel(%arg0: i32, %arg1: i32, %arg2: memref<1x4x128xf32, #tpu.memory_space<vmem>>, %arg3: memref<1x1x4x2xf32, #tpu.memory_space<vmem>>, %arg4: memref<1x1x128xf32, #tpu.memory_space<vmem>>, %arg5: memref<4x3xf32, #tpu.memory_space<vmem>>, %arg6: memref<4x4xf32, #tpu.memory_space<vmem>>, %arg7: memref<4x2xf32, #tpu.memory_space<vmem>>, %arg8: memref<1x4x128xf32, #tpu.memory_space<vmem>>) attributes {dimension_semantics = [#tpu.dimension_semantics<parallel>, #tpu.dimension_semantics<parallel>], iteration_bounds = array<i64: 2, 1>, scalar_prefetch = 0 : i64, scratch_operands = 0 : i64, tpu.core_type = #tpu.core_type<tc>, window_params = [{transform_indices = @transform_0, window_bounds = array<i64: 1, 4, 128>}, {transform_indices = @transform_1, window_bounds = array<i64: 1, 1, 4, 2>}, {transform_indices = @transform_2, window_bounds = array<i64: 1, 1, 128>}, {pipeline_mode = #tpu.pipeline_mode<synchronous>, transform_indices = @transform_3, window_bounds = array<i64: 4, 3>}, {pipeline_mode = #tpu.pipeline_mode<synchronous>, transform_indices = @transform_4, window_bounds = array<i64: 4, 4>}, {pipeline_mode = #tpu.pipeline_mode<synchronous>, transform_indices = @transform_5, window_bounds = array<i64: 4, 2>}, {transform_indices = @transform_6, window_bounds = array<i64: 1, 4, 128>}]} {
    %c0 = arith.constant 0 : index
    %c0_0 = arith.constant 0 : index
    %c0_1 = arith.constant 0 : index
    %0 = vector.load %arg2[%c0, %c0_0, %c0_1] : memref<1x4x128xf32, #tpu.memory_space<vmem>>, vector<1x4x128xf32>
    %1 = vector.shape_cast %0 : vector<1x4x128xf32> to vector<4x128xf32>
    %c0_2 = arith.constant 0 : index
    %c0_3 = arith.constant 0 : index
    %c0_4 = arith.constant 0 : index
    %c0_5 = arith.constant 0 : index
    %2 = vector.load %arg3[%c0_2, %c0_3, %c0_4, %c0_5] : memref<1x1x4x2xf32, #tpu.memory_space<vmem>>, vector<1x1x4x2xf32>
    %3 = vector.shape_cast %2 : vector<1x1x4x2xf32> to vector<4x2xf32>
    %4 = tpu.iota {dimensions = array<i32: 1>} : vector<1x128xi32>
    %c128_i32 = arith.constant 128 : i32
    %5 = arith.muli %arg1, %c128_i32 : i32
    %6 = vector.broadcast %5 : i32 to vector<1x128xi32>
    %7 = arith.addi %4, %6 : vector<1x128xi32>
    %c16_i32 = arith.constant 16 : i32
    %8 = vector.broadcast %c16_i32 : i32 to vector<1x128xi32>
    %9 = arith.cmpi slt, %7, %8 : vector<1x128xi32>
    %cst = arith.constant 0.000000e+00 : f32
    %10 = vector.shape_cast %9 : vector<1x128xi1> to vector<1x128xi1>
    %11 = vector.broadcast %10 : vector<1x128xi1> to vector<4x128xi1>
    %12 = vector.broadcast %cst : f32 to vector<4x128xf32>
    %13 = arith.select %11, %1, %12 : vector<4x128xi1>, vector<4x128xf32>
    %c0_6 = arith.constant 0 : index
    %c0_7 = arith.constant 0 : index
    %14 = vector.load %arg5[%c0_6, %c0_7] : memref<4x3xf32, #tpu.memory_space<vmem>>, vector<4x1xf32>
    %c0_8 = arith.constant 0 : index
    %c1 = arith.constant 1 : index
    %15 = vector.load %arg5[%c0_8, %c1] : memref<4x3xf32, #tpu.memory_space<vmem>>, vector<4x1xf32>
    %c0_9 = arith.constant 0 : index
    %c2 = arith.constant 2 : index
    %16 = vector.load %arg5[%c0_9, %c2] : memref<4x3xf32, #tpu.memory_space<vmem>>, vector<4x1xf32>
    %17 = vector.broadcast %15 : vector<4x1xf32> to vector<4x128xf32>
    %18 = arith.mulf %17, %13 : vector<4x128xf32>
    %c0_i32 = arith.constant 0 : i32
    %19 = vector.broadcast %c0_i32 : i32 to vector<1x128xi32>
    %20 = arith.cmpi eq, %4, %19 : vector<1x128xi32>
    %21 = vector.extract_strided_slice %3 {offsets = [0, 0], sizes = [4, 1], strides = [1, 1]} : vector<4x2xf32> to vector<4x1xf32>
    %c1_i32 = arith.constant 1 : i32
    %22 = tpu.dynamic_rotate %13 by %c1_i32 dim 1 : vector<4x128xf32>, i32 -> vector<4x128xf32>
    %23 = vector.shape_cast %20 : vector<1x128xi1> to vector<1x128xi1>
    %24 = vector.broadcast %23 : vector<1x128xi1> to vector<4x128xi1>
    %25 = vector.shape_cast %21 : vector<4x1xf32> to vector<4x1xf32>
    %26 = vector.broadcast %25 : vector<4x1xf32> to vector<4x128xf32>
    %27 = arith.select %24, %26, %22 : vector<4x128xi1>, vector<4x128xf32>
    %28 = vector.broadcast %14 : vector<4x1xf32> to vector<4x128xf32>
    %29 = arith.mulf %28, %27 : vector<4x128xf32>
    %30 = arith.addf %18, %29 : vector<4x128xf32>
    %c127_i32 = arith.constant 127 : i32
    %31 = vector.broadcast %c127_i32 : i32 to vector<1x128xi32>
    %32 = arith.cmpi eq, %4, %31 : vector<1x128xi32>
    %33 = vector.extract_strided_slice %3 {offsets = [0, 1], sizes = [4, 1], strides = [1, 1]} : vector<4x2xf32> to vector<4x1xf32>
    %c127_i32_10 = arith.constant 127 : i32
    %34 = tpu.dynamic_rotate %13 by %c127_i32_10 dim 1 : vector<4x128xf32>, i32 -> vector<4x128xf32>
    %35 = vector.shape_cast %32 : vector<1x128xi1> to vector<1x128xi1>
    %36 = vector.broadcast %35 : vector<1x128xi1> to vector<4x128xi1>
    %37 = vector.shape_cast %33 : vector<4x1xf32> to vector<4x1xf32>
    %38 = vector.broadcast %37 : vector<4x1xf32> to vector<4x128xf32>
    %39 = arith.select %36, %38, %34 : vector<4x128xi1>, vector<4x128xf32>
    %40 = vector.broadcast %16 : vector<4x1xf32> to vector<4x128xf32>
    %41 = arith.mulf %40, %39 : vector<4x128xf32>
    %42 = arith.addf %30, %41 : vector<4x128xf32>
    %c0_11 = arith.constant 0 : index
    %c0_12 = arith.constant 0 : index
    %43 = vector.load %arg6[%c0_11, %c0_12] : memref<4x4xf32, #tpu.memory_space<vmem>>, vector<4x4xf32>
    %cst_13 = arith.constant dense<0.000000e+00> : vector<4x128xf32>
    %44 = tpu.matmul %43, %42, %cst_13 {dimension_numbers = #tpu.dot_dimension_numbers<[1], [0], [0], [1], [0, 0, 1, 1], [], []>} : vector<4x4xf32>, vector<4x128xf32>, vector<4x128xf32> -> vector<4x128xf32>
    %c0_14 = arith.constant 0 : index
    %c0_15 = arith.constant 0 : index
    %c0_16 = arith.constant 0 : index
    %45 = vector.load %arg4[%c0_14, %c0_15, %c0_16] : memref<1x1x128xf32, #tpu.memory_space<vmem>>, vector<1x1x128xf32>
    %46 = vector.shape_cast %45 : vector<1x1x128xf32> to vector<1x128xf32>
    %cst_17 = arith.constant 0.000000e+00 : f32
    %47 = vector.broadcast %cst_17 : f32 to vector<1x128xf32>
    %48 = arith.cmpf ogt, %46, %47 : vector<1x128xf32>
    %c0_18 = arith.constant 0 : index
    %c0_19 = arith.constant 0 : index
    %49 = vector.load %arg7[%c0_18, %c0_19] : memref<4x2xf32, #tpu.memory_space<vmem>>, vector<4x1xf32>
    %50 = vector.broadcast %49 : vector<4x1xf32> to vector<4x128xf32>
    %51 = arith.addf %44, %50 : vector<4x128xf32>
    %c0_20 = arith.constant 0 : index
    %c1_21 = arith.constant 1 : index
    %52 = vector.load %arg7[%c0_20, %c1_21] : memref<4x2xf32, #tpu.memory_space<vmem>>, vector<4x1xf32>
    %53 = vector.shape_cast %48 : vector<1x128xi1> to vector<1x128xi1>
    %54 = vector.broadcast %53 : vector<1x128xi1> to vector<4x128xi1>
    %55 = vector.shape_cast %52 : vector<4x1xf32> to vector<4x1xf32>
    %56 = vector.broadcast %55 : vector<4x1xf32> to vector<4x128xf32>
    %57 = arith.select %54, %51, %56 : vector<4x128xi1>, vector<4x128xf32>
    %c0_22 = arith.constant 0 : index
    %c0_23 = arith.constant 0 : index
    %c0_24 = arith.constant 0 : index
    %58 = vector.load %arg8[%c0_22, %c0_23, %c0_24] : memref<1x4x128xf32, #tpu.memory_space<vmem>>, vector<1x4x128xf32>
    %59 = vector.shape_cast %58 : vector<1x4x128xf32> to vector<4x128xf32>
    %60 = vector.shape_cast %57 : vector<4x128xf32> to vector<1x4x128xf32>
    tpu.vector_store %arg8[%c0_22, %c0_23, %c0_24], %60 {strides = array<i32>} : memref<1x4x128xf32, #tpu.memory_space<vmem>>, vector<1x4x128xf32>,
    return
  }
  func.func @transform_0(%arg0: i32, %arg1: i32) -> (i32, i32, i32) {
    %c0_i32 = arith.constant 0 : i32
    %c0_i32_0 = arith.constant 0 : i32
    return %arg0, %c0_i32, %arg1 : i32, i32, i32
  }
  func.func @transform_1(%arg0: i32, %arg1: i32) -> (i32, i32, i32, i32) {
    %c0_i32 = arith.constant 0 : i32
    %c0_i32_0 = arith.constant 0 : i32
    %c0_i32_1 = arith.constant 0 : i32
    return %arg0, %arg1, %c0_i32, %c0_i32_0 : i32, i32, i32, i32
  }
  func.func @transform_2(%arg0: i32, %arg1: i32) -> (i32, i32, i32) {
    %c0_i32 = arith.constant 0 : i32
    %c0_i32_0 = arith.constant 0 : i32
    return %arg0, %c0_i32, %arg1 : i32, i32, i32
  }
  func.func @transform_3(%arg0: i32, %arg1: i32) -> (i32, i32) {
    %c0_i32 = arith.constant 0 : i32
    %c0_i32_0 = arith.constant 0 : i32
    %c0_i32_1 = arith.constant 0 : i32
    return %c0_i32, %c0_i32_0 : i32, i32
  }
  func.func @transform_4(%arg0: i32, %arg1: i32) -> (i32, i32) {
    %c0_i32 = arith.constant 0 : i32
    %c0_i32_0 = arith.constant 0 : i32
    %c0_i32_1 = arith.constant 0 : i32
    return %c0_i32, %c0_i32_0 : i32, i32
  }
  func.func @transform_5(%arg0: i32, %arg1: i32) -> (i32, i32) {
    %c0_i32 = arith.constant 0 : i32
    %c0_i32_0 = arith.constant 0 : i32
    %c0_i32_1 = arith.constant 0 : i32
    return %c0_i32, %c0_i32_0 : i32, i32
  }
  func.func @transform_6(%arg0: i32, %arg1: i32) -> (i32, i32, i32) {
    %c0_i32 = arith.constant 0 : i32
    %c0_i32_0 = arith.constant 0 : i32
    return %arg0, %c0_i32, %arg1 : i32, i32, i32
  }
}

</mosaic_0001>

<bundles_post_ra>
// kernel: tpu_custom_call.1
= control target key start
LH: loop header
LB: loop body
LE: loop exit
PB: predicated region body
PF: predicated region fallthrough
CT: control target
= control target key end

     0   :  { %11 = vsyncpa [#allocation3], 0  ;;  %s937_s0 = inlined_call_operand.vmem [shape: f32[2,4,16], index: 0, kind: input, shape index: {}]   ;;  %s938_s1 = inlined_call_operand.vmem [shape: f32[2,1,4,2], index: 1, kind: input, shape index: {}]   ;;  %s939_s2 = inlined_call_operand.vmem [shape: f32[2,1,16], index: 2, kind: input, shape index: {}]   ;;  %s940_s3 = inlined_call_operand.vmem [shape: f32[4,3], index: 3, kind: input, shape index: {}]   ;;  %s941_s4 = inlined_call_operand.vmem [shape: f32[4,4], index: 4, kind: input, shape index: {}]   ;;  %s942_s5 = inlined_call_operand.vmem [shape: f32[4,2], index: 5, kind: input, shape index: {}]   ;;  %s943_s6 = inlined_call_operand.hbm [shape: f32[2,4,16], index: 6, kind: output, shape index: {}]  }
   0x1   :  { %13 = vsyncpa [#allocation3 + $0x1], 0  ;;  %s802_s21 = smov 0   ;;  %s804_s22 = smov 0  }
   0x2   :  { %s806_s23 = smov 0   ;;  %s808_s24 = smov 0  }
   0x3   :  { %s810_s25 = smov 0   ;;  %s812_s26 = smov 0  }
   0x4 LB: > { %s588_s27 = sadd.s32 4294967295, %s757_s26   ;;  %s589_s28 = sadd.s32 4294967294, %s757_s26   ;;  %s757_s26 = sphi %s812_s26, %s19_s26   ;;  %s753_s25 = sphi %s810_s25, %s950_s25   ;;  %s749_s24 = sphi %s808_s24, %s949_s24   ;;  %s745_s23 = sphi %s806_s23, %s948_s23   ;;  %s741_s22 = sphi %s804_s22, %s947_s22   ;;  %s737_s21 = sphi %s802_s21, %s946_s21  }
   0x5   : > { %s31_s29 = sadd.s32 1, %s753_s25  ;;  %s187_s30 = sadd.s32 1, %s745_s23 }
   0x6   : > { %p33_p0 = scmp.ge.s32.totalorder %s31_s29, 2  ;;  %p197_p1 = scmp.ne.s32.totalorder %s745_s23, %s741_s22 }
   0x7   : > { %p198_p2 = scmp.eq.s32.totalorder %s588_s27, 1  ;;  %p203_p3 = scmp.ne.s32.totalorder %s741_s22, %s737_s21 }
   0x8   : > { %s952_s29 = smov (%p33_p0, %s31_s29), 0  ;;  %p204_p5 = scmp.eq.s32.totalorder %s589_s28, 1 }
   0x9   : > { %p842_p4 = por %p198_p2, %p197_p1  ;;  %s182_s8 = ssub.s32 %s753_s25, %s952_s29 }
   0xa   : > { %p592_p6 = scmp.ge.s32.totalorder %s757_s26, 1  ;;  %p185_p7 = scmp.eq.s32.totalorder %s182_s8, 0 }
   0xb   : > { %p849_p8 = por %p204_p5, %p203_p3  ;;  %p260_p9 = scmp.lt.s32.totalorder %s757_s26, 3 }
   0xc   : > { %s855_s10 = scalar_select %p185_p7, %s745_s23, %s187_s30  }
   0xd   : > { %p261_p10 = pnand %p592_p6, %p260_p9 }
   0xe   : > { %v336_v0 = vld [vmem:[%s940_s3] sm:$0xf] (!%p261_p10)  ;;  %p305_p11 = scmp.lt.s32.totalorder (!%p261_p10), %s749_s24, 1  ;;  %v759_v1 = vmov (!%p261_p10), 0   ;;  %v327_v2 = vlaneseq (!%p261_p10)  ;;  %v760_v3 = vmov (!%p261_p10), 1   ;;  %v761_v7 = vmov (!%p261_p10), 2  }
   0xf   : > { %264 = sbr.rel (%p261_p10) target bundleno = 401 (0x191), region = 44  ;;  %673 = vset.pattern.permute.xlu1 (!%p261_p10), %v759_v1  ;;  %671 = vset.pattern.permute.xlu0 (!%p261_p10), %v759_v1  ;;  %s762_s27 = smov (!%p261_p10), 127   ;;  %v764_v9 = vmov (!%p261_p10), 0.0   ;;  %vm765_vm1 = vmmov (!%p261_p10), 0   ;;  %v379_v10 = vld [vmem:[%s942_s5] sm:$0xf] (!%p261_p10) }
  0x10   : > { %355 = vperm.xlu1 (!%p261_p10), %673, %v336_v0   ;;  %v328_v5 = vand.u32 (!%p261_p10), 127, %v327_v2  ;;  %s763_s28 = smov (!%p261_p10), 1   ;;  %604 = vmatprep.subr.mxu0 (!%p261_p10), %v764_v9  ;;  %vm389_vm4 = vcmask (!%p261_p10), 1043456   ;;  %v376_v25 = vld [vmem:[%s941_s4] sm:$0xf] (!%p261_p10)  ;;  %vm385_vm5 = vcmask (!%p261_p10), 31744  }
  0x11   : > { %606 = vmatprep.mubr.msk.f32.mxu0 (!%p261_p10), %vm765_vm1, %v764_v9  ;;  %v465_v27 = vshrl.u32 (!%p261_p10), %v327_v2, 7  ;;  %s599_s19 = sshll.u32 (!%p261_p10), %s749_s24, 6  ;;  %s766_s11 = smov (!%p261_p10), [#allocation2]  }
  0x12   : > { %vm332_vm0 = vcmp.lt.s32.totalorder (!%p261_p10), %v328_v5, 16  ;;  %vm360_vm2 = vcmp.eq.s32.totalorder (!%p261_p10), %v328_v5, 127  ;;  %vm343_vm3 = vcmp.eq.s32.totalorder (!%p261_p10), %v328_v5, 0  ;;  %s890_s30 = scalar_lea.hbm (!%p261_p10), %s943_s6, %s599_s19  ;;  %s683_s12 = sshll.u32 (!%p261_p10), %s766_s11, 4  ;;  %s684_s12 = int_to_ptr.vmem [resolvable:$false] %s683_s12 }
  0x13   : > { %v466_v28 = vsub.s32 (!%p261_p10), 0, %v465_v27 }
  0x14   : > { %674 = vset.pattern.permute.xlu1 (!%p261_p10), %v760_v3 }
  0x16   : > { %s864_s13 = scalar_select %p305_p11, %s749_s24, 1 }
  0x18   : > { %s594_s14 = sshll.u32 %s864_s13, 2  ;;  %s324_s16 = scalar_lea.vmem %s939_s2, %s864_s13 }
  0x19   : > { %s318_s17 = scalar_lea.vmem %s938_s1, %s594_s14  ;;  %s311_s20 = scalar_lea.vmem %s937_s0, %s594_s14  ;;  %v377_v26 = vld [vmem:[%s324_s16] sm:$0x1] }
  0x1a   : > { %v326_v4 = vld [vmem:[%s318_s17] sm:$0xf]  ;;  %vm378_vm6 = vcmp.gt.f32.partialorder %v377_v26, 0.0  ;;  %s302_s17 = sand.u32 1, %s741_s22   ;;  %s685_s14 = scalar_lea.vmem %s684_s12, 128 }
  0x1b   : > { %366 = vperm.xlu1 %674, %v326_v4   ;;  %350 = vperm.xlu0 %671, %v326_v4   ;;  %v325_v6 = vld [vmem:[%s311_s20] sm:$0xf]  ;;  %v463_v29 = vsel %vm378_vm6, 1, %v759_v1  ;;  %s593_s18 = sshll.u32 %s302_s17, 2  ;;  %s476_s24 = scalar_lea.sflag [#allocation3], %s302_s17 }
  0x1c   : > { %v335_v8 = vsel %vm332_vm0, %v325_v6, 0.0  ;;  %v467_v30 = vrot.slane %v463_v29, %v466_v28  ;;  %s304_s20 = scalar_lea.vmem [#allocation2], %s593_s18 }
  0x1e   : > { %vm468_vm7 = vcmp.eq.s32.totalorder %v467_v30, 1 }
  0x1f   : > { %675 = vset.pattern.permute.xlu1 %v761_v7  ;;  %672 = vset.pattern.permute.xlu0 %v760_v3 }
  0x20   : > { %371 = vperm.xlu1 %675, %v336_v0   ;;  %339 = vperm.xlu0 %672, %v336_v0  }
  0x24   : > { %361 = vrot.lane.b32.xlu1 %v335_v8, %s762_s27  ;;  %344 = vrot.lane.b32.xlu0 %v335_v8, %s763_s28  ;;  %s490_s27 = sshll.u32 %s304_s20, 4  ;;  %s892_s27 = int_to_ptr.vmem [resolvable:$true] %s490_s27 }
  0x25   : > { %676 = vset.pattern.permute.xlu0 %v759_v1  ;;  %677 = vset.pattern.permute.xlu1 %v760_v3  ;;  %s679_s8 = scalar_lea.vmem %s892_s27, 64  ;;  %p686_p1 = scmp.lt.s32.totalorder %s892_s27, %s684_s12 }
  0x26   : > { %p680_p12 = scmp.ne.s32.totalorder %s892_s27, %s679_s8  ;;  %p687_p2 = scmp.lt.s32.totalorder %s685_s14, %s679_s8 }
  0x28   : > { %382 = vperm.xlu0 %676, %v379_v10   ;;  %470 = vperm.xlu1 %677, %v379_v10   ;;  %p681_p13 = pnand %p680_p12, %p842_p4  ;;  %p688_p3 = por %p687_p2, %p686_p1 }
  0x2a   : > { %p682_p0 = pneg %p681_p13 }
  0x2c   : > { %678 = vset.pattern.permute.xlu0 %v760_v3  ;;  %p689_p5 = pnand %p688_p3, %p682_p0 }
  0x8f   : > { %v356_v11 = vpop.permute.xlu1 %355 }
  0x9a   : > { %v351_v12 = vpop.permute.xlu0 %350  ;;  %v367_v13 = vpop.permute.xlu1 %366 }
  0x9f   : > { %v372_v14 = vpop.permute.xlu1 %371  ;;  %v340_v15 = vpop.permute.xlu0 %339 }
  0xa0   : > { %v342_v20 = vmul.f32 %v340_v15, %v335_v8 }
  0xa3   : > { %v362_v16 = vpop.permute.xlu1 %361  ;;  %v345_v17 = vpop.permute.xlu0 %344 }
  0xa4   : > { %v369_v18 = vsel %vm360_vm2, %v367_v13, %v362_v16  ;;  %v353_v19 = vsel %vm343_vm3, %v351_v12, %v345_v17 }
  0xa5   : > { %v358_v21 = vmul.f32 %v356_v11, %v353_v19  ;;  %v374_v22 = vmul.f32 %v372_v14, %v369_v18 }
  0xa7   : > { %v359_v23 = vadd.f32 %v358_v21, %v342_v20  ;;  %v383_v31 = vpop.permute.xlu0 %382  ;;  %v471_v33 = vpop.permute.xlu1 %470 }
  0xa9   : > { %v375_v24 = vadd.f32 %v374_v22, %v359_v23 }
  0xab   : > { %605 = vmatpush3.msk.msra.mxu0 %vm389_vm4, %v375_v24 }
  0xac   : > { %607 = vmatmul.mubr.msk.f32.vlgmr.msra.gmra.mrb[0].mxu0 %vm385_vm5, %v376_v25 }
 0x17f   : > { %v459_v32 = vpop.f32.mrb[0].mxu0 }
 0x180   : > { %v460_v34 = vadd.f32 %v459_v32, %v383_v31  ;;  %v608_v35 = vpop.f32.mrb[1].mxu0 }
 0x182   : > { %v473_v36 = vsel %vm468_vm7, %v460_v34, %v471_v33 }
 0x183   : > { %474 = vst [vmem:[%s304_s20] sm:$0xf] %v473_v36 }
 0x184   : > { %692 = shalt.err (!%p689_p5)
}
 0x185   : > { %s693_s15 = scalar_lea.hbm %s890_s30, 64  ;;  %s697_s18 = scalar_lea.hbm %s943_s6, 128 }
 0x186   : > { %p694_p6 = scmp.ne.s32.totalorder %s890_s30, %s693_s15  ;;  %p698_p10 = scmp.lt.u32.totalorder %s890_s30, %s943_s6 }
 0x187   : > { %p699_p11 = scmp.lt.u32.totalorder %s697_s18, %s693_s15  ;;  %p701_p13 = scmp.lt.u32.totalorder %s693_s15, %s890_s30 }
 0x188   : > { %p695_p7 = pnand %p694_p6, %p842_p4 }
 0x189   : > { %p700_p12 = por %p699_p11, %p698_p10 }
 0x18a   : > { %p696_p9 = pneg %p695_p7 }
 0x18b   : > { %p702_p0 = por %p701_p13, %p700_p12 }
 0x18d   : > { %p703_p1 = pnand %p702_p0, %p696_p9 }
 0x18f   : > { %706 = shalt.err (!%p703_p1)
}
 0x190   : > { %609 = dma.vmem_to_hbm [thread:$0]  (%p842_p4), %s892_s27, 64, %s890_s30, %s476_s24  }
 0x191 PF: > { %p615_p2 = scmp.ge.s32.totalorder %s757_s26, 2  ;;  %s502_s13 = sand.u32 1, %s737_s21  }
 0x192   : > { %s503_s28 = scalar_lea.sflag [#allocation3], %s502_s13 }
 0x193   : > { %p612_p3 = pnand %p615_p2, %p849_p8 }
 0x195   : > { %732 = dma.done.wait (!%p612_p3), %s503_s28, 64  }
 0x196   : > { %734 = vsyncadd (!%p612_p3), %s503_s28, 4294967232  ;;  %s19_s26 = sadd.s32 1, %s757_s26   ;;  %s946_s21 = smov %s741_s22 }
 0x197   : > { %p16_p5 = scmp.ge.s32.totalorder %s19_s26, 4   ;;  %s947_s22 = smov %s745_s23 }
 0x198   : > { %s948_s23 = smov %s855_s10  ;;  %s949_s24 = smov %s753_s25 }
 0x199   : > { %s950_s25 = smov %s952_s29  ;;  %18 = sbr.rel (!%p16_p5) target bundleno = 4 (0x4), region = 85 }
 0x1a0   :  { %508 = vsyncpa [#allocation3], 1 }
 0x1a1   :  { %510 = vsyncpa [#allocation3 + $0x1], 1 }

</bundles_post_ra>
